<compile_context>
chip_gen: v7x
topology: tpu7x:2x2x1
jax: 0.10.0
libtpu: 0.0.40
codegen_flags: <defaults>
</compile_context>

<pallas_src>
import jax
import jax.numpy as jnp
from jax.experimental import pallas as pl
from jax.experimental.pallas import tpu as pltpu


def _rotary_kernel(x_ref, cos_ref, sin_ref, o_ref):
    # x_ref / o_ref : (block_rows, D)   rows = flattened (seq, head) pairs
    # cos_ref       : (block_rows, D)   = [cos,  cos]   per row, float32
    # sin_ref       : (block_rows, D)   = [sin, -sin]   per row, float32
    x = x_ref[...].astype(jnp.float32)                 # f32 math, like the PyTorch module
    half = x.shape[-1] // 2
    # Swap the two halves of every row (each row is one head of one position, width D):
    # (x1, x2) -> (x2, x1).  Lane-slice + concat lowers on Mosaic and runs in interpret mode.
    x_swapped = jnp.concatenate([x[:, half:], x[:, :half]], axis=1)
    o_ref[...] = (x * cos_ref[...] + x_swapped * sin_ref[...]).astype(o_ref.dtype)


def make_rotary_tables(seq_len: int, dim: int, base: float = 10000.0):
    """Equivalent of the PyTorch module's cached cos/sin buffers ((T, dim//2) each, f32)."""
    inv_freq = (1.0 / base) ** (jnp.arange(0, dim, 2, dtype=jnp.float32) / dim)
    t = jnp.arange(seq_len, dtype=jnp.float32)
    freqs = jnp.outer(t, inv_freq)                     # (T, dim//2)
    return jnp.cos(freqs), jnp.sin(freqs)


def _choose_block_rows(total_rows: int, D: int, x_itemsize: int,
                       target_vmem_bytes: int = 32 << 20,
                       max_block_rows: int = 32768) -> int:
    """Rows (flattened seq*head) per grid step.

    Counts ALL double-buffered blocks against the budget:
      x in + x out (x dtype) and cos + sin (f32), each x2 for pipelining.
    Blocks are dense (rows multiple of 8, D = lane dim), so there is no sublane-padding
    multiplier to account for.  48 MiB vmem_limit leaves headroom on every generation
    (v7x: 64 MiB per TC physical; v5e/v6e: 128 MiB).
    """
    bytes_per_row = D * (2 * 2 * x_itemsize + 2 * 2 * 4)   # 2 bufs * (in+out) + 2 bufs * (cos+sin)
    rows = target_vmem_bytes // max(1, bytes_per_row)
    rows = int(min(rows, max_block_rows))
    if rows >= total_rows:
        return total_rows                               # full extent (always a legal block)
    return max(8, (rows // 8) * 8)                      # keep sublane dim a multiple of 8


def rotary_forward(x: jax.Array, base: float = 10000.0, *,
                   block_rows: int | None = None,
                   target_vmem_bytes: int = 32 << 20,
                   donate_input: bool = False) -> jax.Array:
    """Apply rotary embedding to x of shape (B, T, H, D) (batch, seq, heads, head_dim)."""
    B, T, H, D = x.shape
    assert D % 2 == 0, "head_dim must be even"
    R = T * H                                           # flattened (seq, head) rows
    itemsize = jnp.dtype(x.dtype).itemsize

    # Tables in f32 (matches PyTorch f32 trig/multiply); expanded per (seq, head) row so the
    # kernel needs no broadcast and every operand is a dense 2-D (rows, D) slab.
    cos, sin = make_rotary_tables(T, D, base)                       # (T, D//2) f32
    cos_full = jnp.concatenate([cos, cos], axis=-1)                 # (T, D)
    sin_signed = jnp.concatenate([sin, -sin], axis=-1)              # (T, D)
    cos_rows = jnp.repeat(cos_full, H, axis=0)                      # (R, D) rows align with x rows
    sin_rows = jnp.repeat(sin_signed, H, axis=0)                    # (R, D)

    x_flat = x.reshape(B, R, D)                                     # free, contiguous reshape

    if block_rows is None:
        block_rows = _choose_block_rows(R, D, itemsize, target_vmem_bytes)
    num_row_blocks = pl.cdiv(R, block_rows)

    flops = 3 * B * R * D                                           # 2 mul + 1 add per element
    bytes_accessed = 2 * B * R * D * itemsize + 2 * R * D * 4       # x in/out + tables (read once)

    out_flat = pl.pallas_call(
        _rotary_kernel,
        out_shape=jax.ShapeDtypeStruct((B, R, D), x.dtype),
        # Batch innermost: the table block index is constant across the inner B loop, so the
        # pipeline does not re-fetch cos/sin on every step (fetched once per row-block).
        grid=(num_row_blocks, B),
        in_specs=[
            pl.BlockSpec((None, block_rows, D), lambda r, b: (b, r, 0)),
            pl.BlockSpec((block_rows, D), lambda r, b: (r, 0)),
            pl.BlockSpec((block_rows, D), lambda r, b: (r, 0)),
        ],
        out_specs=pl.BlockSpec((None, block_rows, D), lambda r, b: (b, r, 0)),
        compiler_params=pltpu.CompilerParams(
            dimension_semantics=("parallel", "parallel"),   # shard row-blocks x B over v7x's 2 TCs
            vmem_limit_bytes=48 * 1024 * 1024,              # <= v7x 64 MiB/TC; ample on v5e/v6e
        ),
        cost_estimate=pl.CostEstimate(flops=flops, transcendentals=0,
                                      bytes_accessed=bytes_accessed),
        # Opt-in in-place update: rotation reads only within the resident block before writing,
        # so aliasing x with the output is safe; enable when x is dead after this op.
        input_output_aliases=({0: 0} if donate_input else {}),
    )(x_flat, cos_rows, sin_rows)

    return out_flat.reshape(B, T, H, D)


def rotary_reference(x: jax.Array, base: float = 10000.0) -> jax.Array:
    """Pure-JAX reference matching the PyTorch forward exactly (f32 math, cast back)."""
    B, T, H, D = x.shape
    cos, sin = make_rotary_tables(T, D, base)
    cos = cos[None, :, None, :]
    sin = sin[None, :, None, :]
    x1, x2 = jnp.split(x.astype(jnp.float32), 2, axis=3)
    y1 = x1 * cos + x2 * sin
    y2 = x1 * -sin + x2 * cos
    return jnp.concatenate([y1, y2], axis=3).astype(x.dtype)


if __name__ == "__main__":
    k1, k2 = jax.random.split(jax.random.PRNGKey(0))

    # Small shapes consistent with record_14 usage: head_dim = 128.
    B, T, H, D = 2, 8, 4, 128
    x = jax.random.normal(k1, (B, T, H, D), dtype=jnp.float32)

    out = jax.block_until_ready(rotary_forward(x))
    ref = jax.block_until_ready(rotary_reference(x))
    assert out.shape == (B, T, H, D)
    assert out.dtype == x.dtype
    assert jnp.allclose(out, ref, atol=1e-5, rtol=1e-5), "f32 mismatch vs reference"

    # bf16 inputs: tables and in-kernel math stay f32 (matches PyTorch), output cast to bf16.
    xb = jax.random.normal(k2, (1, 16, 6, 128), dtype=jnp.bfloat16)
    outb = jax.block_until_ready(rotary_forward(xb))
    refb = jax.block_until_ready(rotary_reference(xb))
    assert outb.dtype == jnp.bfloat16
    assert jnp.allclose(outb.astype(jnp.float32), refb.astype(jnp.float32),
                        atol=1e-2, rtol=1e-2), "bf16 mismatch vs reference"

    print("KERNEL_OK")
</pallas_src>

<mosaic_0001>
module attributes {stable_mosaic.version = 11 : i64} {
  func.func @_rotary_kernel(%arg0: i32, %arg1: i32, %arg2: memref<1x32x128xf32, #tpu.memory_space<vmem>>, %arg3: memref<32x128xf32, #tpu.memory_space<vmem>>, %arg4: memref<32x128xf32, #tpu.memory_space<vmem>>, %arg5: memref<1x32x128xf32, #tpu.memory_space<vmem>>) attributes {dimension_semantics = [#tpu.dimension_semantics<parallel>, #tpu.dimension_semantics<parallel>], iteration_bounds = array<i64: 1, 2>, scalar_prefetch = 0 : i64, scratch_operands = 0 : i64, tpu.core_type = #tpu.core_type<tc>, window_params = [{transform_indices = @transform_0, window_bounds = array<i64: 1, 32, 128>}, {transform_indices = @transform_1, window_bounds = array<i64: 32, 128>}, {transform_indices = @transform_2, window_bounds = array<i64: 32, 128>}, {transform_indices = @transform_3, window_bounds = array<i64: 1, 32, 128>}]} {
    %c0 = arith.constant 0 : index
    %c0_0 = arith.constant 0 : index
    %c0_1 = arith.constant 0 : index
    %0 = vector.load %arg2[%c0, %c0_0, %c0_1] : memref<1x32x128xf32, #tpu.memory_space<vmem>>, vector<1x32x128xf32>
    %1 = vector.shape_cast %0 : vector<1x32x128xf32> to vector<32x128xf32>
    %2 = vector.extract_strided_slice %1 {offsets = [0, 64], sizes = [32, 64], strides = [1, 1]} : vector<32x128xf32> to vector<32x64xf32>
    %3 = vector.extract_strided_slice %1 {offsets = [0, 0], sizes = [32, 64], strides = [1, 1]} : vector<32x128xf32> to vector<32x64xf32>
    %4 = tpu.concatenate %2, %3 in 1 : vector<32x64xf32>, vector<32x64xf32> -> vector<32x128xf32>
    %c0_2 = arith.constant 0 : index
    %c0_3 = arith.constant 0 : index
    %5 = vector.load %arg3[%c0_2, %c0_3] : memref<32x128xf32, #tpu.memory_space<vmem>>, vector<32x128xf32>
    %6 = arith.mulf %1, %5 : vector<32x128xf32>
    %c0_4 = arith.constant 0 : index
    %c0_5 = arith.constant 0 : index
    %7 = vector.load %arg4[%c0_4, %c0_5] : memref<32x128xf32, #tpu.memory_space<vmem>>, vector<32x128xf32>
    %8 = arith.mulf %4, %7 : vector<32x128xf32>
    %9 = arith.addf %6, %8 : vector<32x128xf32>
    %c0_6 = arith.constant 0 : index
    %c0_7 = arith.constant 0 : index
    %c0_8 = arith.constant 0 : index
    %10 = vector.load %arg5[%c0_6, %c0_7, %c0_8] : memref<1x32x128xf32, #tpu.memory_space<vmem>>, vector<1x32x128xf32>
    %11 = vector.shape_cast %10 : vector<1x32x128xf32> to vector<32x128xf32>
    %12 = vector.shape_cast %9 : vector<32x128xf32> to vector<1x32x128xf32>
    tpu.vector_store %arg5[%c0_6, %c0_7, %c0_8], %12 {strides = array<i32>} : memref<1x32x128xf32, #tpu.memory_space<vmem>>, vector<1x32x128xf32>,
    return
  }
  func.func @transform_0(%arg0: i32, %arg1: i32) -> (i32, i32, i32) {
    %c0_i32 = arith.constant 0 : i32
    %c0_i32_0 = arith.constant 0 : i32
    return %arg1, %arg0, %c0_i32 : i32, i32, i32
  }
  func.func @transform_1(%arg0: i32, %arg1: i32) -> (i32, i32) {
    %c0_i32 = arith.constant 0 : i32
    %c0_i32_0 = arith.constant 0 : i32
    return %arg0, %c0_i32 : i32, i32
  }
  func.func @transform_2(%arg0: i32, %arg1: i32) -> (i32, i32) {
    %c0_i32 = arith.constant 0 : i32
    %c0_i32_0 = arith.constant 0 : i32
    return %arg0, %c0_i32 : i32, i32
  }
  func.func @transform_3(%arg0: i32, %arg1: i32) -> (i32, i32, i32) {
    %c0_i32 = arith.constant 0 : i32
    %c0_i32_0 = arith.constant 0 : i32
    return %arg1, %arg0, %c0_i32 : i32, i32, i32
  }
}

</mosaic_0001>

<bundles_post_ra>
// kernel: tpu_custom_call.1
= control target key start
LH: loop header
LB: loop body
LE: loop exit
PB: predicated region body
PF: predicated region fallthrough
CT: control target
= control target key end

     0   :  { %8 = vsyncpa [#allocation3], 0  ;;  %s1002_s0 = inlined_call_operand.hbm [shape: f32[2,32,128], index: 0, kind: input, shape index: {}]   ;;  %s1003_s1 = inlined_call_operand.hbm [shape: f32[32,128], index: 1, kind: input, shape index: {}]   ;;  %s1004_s2 = inlined_call_operand.hbm [shape: f32[32,128], index: 2, kind: input, shape index: {}]   ;;  %s1005_s3 = inlined_call_operand.hbm [shape: f32[2,32,128], index: 3, kind: output, shape index: {}]  }
   0x1   :  { %10 = vsyncpa [#allocation3 + $0x1], 0 }
   0x2   :  { %11 = vsyncpa [#allocation6], 0 }
   0x3   :  { %12 = vsyncpa [#allocation4], 0 }
   0x4   :  { %14 = vsyncpa [#allocation4 + $0x1], 0  ;;  %s738_s12 = smov 0   ;;  %s740_s13 = smov 0  }
   0x5   :  { %s742_s14 = smov 0   ;;  %s744_s15 = smov 0  }
   0x6   :  { %s746_s16 = smov 0   ;;  %s748_s17 = smov 0  }
   0x7 LB: > { %s426_s18 = sadd.s32 4294967295, %s707_s17   ;;  %s427_s19 = sadd.s32 4294967294, %s707_s17   ;;  %s707_s17 = sphi %s748_s17, %s20_s17   ;;  %s703_s16 = sphi %s746_s16, %s1027_s16   ;;  %s699_s15 = sphi %s744_s15, %s1026_s15   ;;  %s695_s14 = sphi %s742_s14, %s1025_s14   ;;  %s691_s13 = sphi %s740_s13, %s1024_s13   ;;  %s687_s12 = sphi %s738_s12, %s1023_s12  }
   0x8   : > { %p54_p0 = scmp.ne.s32.totalorder %s691_s13, %s687_s12  ;;  %p772_p1 = scmp.eq.s32.totalorder %s426_s18, 0 }
   0x9   : > { %p776_p2 = scmp.eq.s32.totalorder %s426_s18, 1  ;;  %p138_p3 = scmp.eq.s32.totalorder %s427_s19, 1 }
   0xa   : > { %s1010_s20 = scalar_select %p772_p1, 1, 0 }
   0xb   : > { %p782_p4 = por %p772_p1, %p54_p0  ;;  %p428_p5 = scmp.ge.s32.totalorder %s707_s17, 1 }
   0xc   : > { %p787_p6 = por %p138_p3, %p54_p0  ;;  %p145_p7 = scmp.lt.s32.totalorder %s707_s17, 3 }
   0xd   : > { %s1012_s22 = scalar_select %p782_p4, 1, 0 }
   0xe   : > { %s1013_s23 = scalar_select %p787_p6, 1, 0 }
   0xf   : > { %p792_p8 = pnand %p428_p5, %p145_p7  ;;  %s709_s25 = smov [#allocation5]  }
  0x10   : > { %s160_s26 = sshll.u32 %s709_s25, 4  ;;  %s710_s28 = smov [#allocation7]   ;;  %s796_s26 = int_to_ptr.vmem [resolvable:$true] %s160_s26 }
  0x11   : > { %p459_p9 = pneg %p792_p8  ;;  %s176_s29 = sshll.u32 %s710_s28, 4  ;;  %s807_s29 = int_to_ptr.vmem [resolvable:$true] %s176_s29 }
  0x12   : > { %s535_s5 = scalar_lea.hbm %s1003_s1, 512 }
  0x13   : > { %p803_p11 = pnand %p459_p9, %p772_p1  ;;  %p536_p12 = scmp.ne.s32.totalorder %s1003_s1, %s535_s5 }
  0x14   : > { %p542_p5 = scmp.lt.u32.totalorder %s535_s5, %s1003_s1 }
  0x15   : > { %p537_p13 = pneg %p803_p11 }
  0x17   : > { %p538_p0 = pnand %p537_p13, %p536_p12 }
  0x19   : > { %p539_p3 = pneg %p538_p0 }
  0x1b   : > { %p544_p7 = pnand %p542_p5, %p539_p3 }
  0x1d   : > { %547 = shalt.err (!%p544_p7)
}
  0x1e   : > { %s548_s10 = scalar_lea.vmem %s796_s26, 512  ;;  %p556_p1 = scmp.lt.s32.totalorder %s796_s26, %s796_s26 }
  0x1f   : > { %p549_p9 = scmp.ne.s32.totalorder %s796_s26, %s548_s10  ;;  %p557_p12 = scmp.lt.s32.totalorder %s548_s10, %s548_s10 }
  0x21   : > { %p551_p10 = pnand %p549_p9, %p537_p13  ;;  %p558_p0 = por %p557_p12, %p556_p1 }
  0x23   : > { %p552_p6 = pneg %p551_p10 }
  0x25   : > { %p559_p4 = pnand %p558_p0, %p552_p6 }
  0x27   : > { %562 = shalt.err (!%p559_p4)
}
  0x28   : > { %s711_s11 = smov 128   ;;  %s712_s18 = smov 8  }
  0x29   : > { %462 = dma.hbm_to_vmem [thread:$0]  (!%p803_p11), %s1003_s1, 512, %s796_s26, [#allocation6], %s711_s11, %s711_s11, %s712_s18  }
  0x2a   : > { %s563_s4 = scalar_lea.hbm %s1004_s2, 512 }
  0x2b   : > { %p564_p1 = scmp.ne.s32.totalorder %s1004_s2, %s563_s4  ;;  %p570_p10 = scmp.lt.u32.totalorder %s563_s4, %s1004_s2 }
  0x2d   : > { %p566_p4 = pnand %p564_p1, %p537_p13 }
  0x2f   : > { %p567_p6 = pneg %p566_p4 }
  0x31   : > { %p572_p3 = pnand %p570_p10, %p567_p6 }
  0x33   : > { %575 = shalt.err (!%p572_p3)
}
  0x34   : > { %s576_s26 = scalar_lea.vmem %s807_s29, 512  ;;  %p584_p12 = scmp.lt.s32.totalorder %s807_s29, %s807_s29 }
  0x35   : > { %p577_p5 = scmp.ne.s32.totalorder %s807_s29, %s576_s26  ;;  %p585_p0 = scmp.lt.s32.totalorder %s576_s26, %s576_s26 }
  0x37   : > { %p579_p7 = pnand %p577_p5, %p537_p13  ;;  %p586_p1 = por %p585_p0, %p584_p12 }
  0x39   : > { %p580_p9 = pneg %p579_p7 }
  0x3b   : > { %p587_p4 = pnand %p586_p1, %p580_p9 }
  0x3d   : > { %590 = shalt.err (!%p587_p4)
}
  0x3e   : > { %465 = dma.hbm_to_vmem [thread:$0]  (!%p803_p11), %s1004_s2, 512, %s807_s29, [#allocation6], %s711_s11, %s711_s11, %s712_s18  }
  0x3f   : > { %s29_s27 = sadd.s32 1, %s703_s16  ;;  %s41_s19 = sadd.s32 1, %s695_s14 }
  0x40   : > { %p30_p13 = scmp.ge.s32.totalorder %s29_s27, 2  ;;  %p48_p6 = scmp.ne.s32.totalorder %s695_s14, %s691_s13 }
  0x41   : > { %p49_p10 = scmp.eq.s32.totalorder %s707_s17, 0  ;;  %p476_p3 = scmp.lt.s32.totalorder %s707_s17, 2 }
  0x42   : > { %s1029_s27 = smov (%p30_p13, %s29_s27), 0  ;;  %p877_p7 = por %p776_p2, %p48_p6 }
  0x43   : > { %p50_p5 = por %p49_p10, %p48_p6  ;;  %s36_s28 = ssub.s32 %s703_s16, %s1029_s27 }
  0x44   : > { %s1016_s25 = scalar_select %p877_p7, 1, 0 }
  0x45   : > { %s190_s30 = sand.u32 1, %s695_s14   ;;  %p39_p9 = scmp.eq.s32.totalorder %s36_s28, 0 }
  0x46   : > { %s432_s29 = sshll.u32 %s190_s30, 5  ;;  %s445_s4 = sshll.u32 %s703_s16, 9 }
  0x47   : > { %s886_s5 = scalar_select %p39_p9, %s695_s14, %s41_s19  }
  0x48   : > { %s891_s8 = scalar_lea.hbm %s1002_s0, %s445_s4  ;;  %s194_s21 = scalar_lea.vmem [#allocation2], %s432_s29 }
  0x49   : > { %s203_s26 = sshll.u32 %s194_s21, 4  ;;  %p895_p2 = pnand %p476_p3, %p50_p5  ;;  %s899_s26 = int_to_ptr.vmem [resolvable:$true] %s203_s26 }
  0x4a   : > { %s901_s10 = scalar_lea.sflag [#allocation3], %s190_s30  ;;  %s591_s19 = scalar_lea.hbm %s891_s8, 512 }
  0x4b   : > { %p592_p11 = scmp.ne.s32.totalorder %s891_s8, %s591_s19  ;;  %p593_p12 = pneg %p895_p2 }
  0x4c   : > { %s596_s4 = scalar_lea.hbm %s1002_s0, 1024  ;;  %p597_p4 = scmp.lt.u32.totalorder %s891_s8, %s1002_s0 }
  0x4d   : > { %p594_p0 = pnand %p593_p12, %p592_p11  ;;  %p598_p13 = scmp.lt.u32.totalorder %s596_s4, %s591_s19 }
  0x4e   : > { %p600_p10 = scmp.lt.u32.totalorder %s591_s19, %s891_s8 }
  0x4f   : > { %p595_p1 = pneg %p594_p0  ;;  %p599_p6 = por %p598_p13, %p597_p4 }
  0x51   : > { %p601_p3 = por %p600_p10, %p599_p6 }
  0x53   : > { %p602_p5 = pnand %p601_p3, %p595_p1 }
  0x55   : > { %605 = shalt.err (!%p602_p5)
}
  0x56   : > { %s606_s30 = scalar_lea.vmem %s899_s26, 512  ;;  %s713_s21 = smov [#allocation2]  }
  0x57   : > { %p607_p9 = scmp.ne.s32.totalorder %s899_s26, %s606_s30  ;;  %s611_s28 = sshll.u32 %s713_s21, 4  ;;  %s612_s28 = int_to_ptr.vmem [resolvable:$false] %s611_s28 }
  0x58   : > { %s613_s29 = scalar_lea.vmem %s612_s28, 1024  ;;  %p614_p7 = scmp.lt.s32.totalorder %s899_s26, %s612_s28 }
  0x59   : > { %p609_p11 = pnand %p607_p9, %p593_p12  ;;  %p615_p4 = scmp.lt.s32.totalorder %s613_s29, %s606_s30 }
  0x5b   : > { %p610_p0 = pneg %p609_p11  ;;  %p616_p13 = por %p615_p4, %p614_p7 }
  0x5d   : > { %p617_p6 = pnand %p616_p13, %p610_p0 }
  0x5f   : > { %620 = shalt.err (!%p617_p6)
}
  0x60   : > { %469 = dma.hbm_to_vmem [thread:$0]  (!%p895_p2), %s891_s8, 512, %s899_s26, %s901_s10, %s711_s11, %s711_s11, %s712_s18  }
  0x61   : > { %215 = sbr.rel (%p792_p8) target bundleno = 247 (0xf7), region = 32  ;;  %s935_s19 = sand.u32 (!%p792_p8), 1, %s691_s13  }
  0x62   : > { %s436_s4 = sshll.u32 (!%p792_p8), %s935_s19, 5  ;;  %s218_s6 = scalar_lea.sflag (!%p792_p8), [#allocation3], %s935_s19 }
  0x63   : > { %s221_s7 = scalar_lea.vmem (!%p792_p8), [#allocation2], %s436_s4  ;;  %p1018_p7 = scmp.ne.s32.totalorder (!%p792_p8), %s1012_s22, 0 }
  0x68   : > { %674 = dma.done.wait (%p1018_p7), %s218_s6, 512  }
  0x69   : > { %676 = vsyncadd (%p1018_p7), %s218_s6, 4294966784  ;;  %p1019_p12 = scmp.ne.s32.totalorder %s1010_s20, 0 }
  0x6b   : > { %678 = dma.done.wait (%p1019_p12), [#allocation6], 1024  }
  0x6c   : > { %680 = vsyncadd (%p1019_p12), [#allocation6], 4294966272  ;;  %v258_v0 = vld [vmem:[%s221_s7 + $0x10] sm:$0xff]  ;;  %v256_v1 = vld [vmem:[%s221_s7] sm:$0xff]  ;;  %s714_s24 = smov 64   ;;  %s251_s20 = scalar_lea.vmem [#allocation8], %s436_s4 }
  0x6d   : > { %268 = vrot.lane.b32.xlu1 %v258_v0, %s714_s24  ;;  %264 = vrot.lane.b32.xlu0 %v256_v1, %s714_s24  ;;  %v259_v2 = vld [vmem:[%s221_s7 + $0x18] sm:$0xff]  ;;  %v257_v3 = vld [vmem:[%s221_s7 + $0x8] sm:$0xff]  ;;  %v278_v4 = vld [vmem:[#allocation5 + $0x10] sm:$0xff]  ;;  %s316_s22 = sshll.u32 %s251_s20, 4  ;;  %s446_s11 = sshll.u32 %s699_s15, 9  ;;  %s948_s22 = int_to_ptr.vmem [resolvable:$true] %s316_s22 }
  0x6e   : > { %v276_v5 = vld [vmem:[#allocation5] sm:$0xff]  ;;  %v286_v6 = vld [vmem:[#allocation7 + $0x10] sm:$0xff]  ;;  %v282_v8 = vmul.f32 %v278_v4, %v258_v0  ;;  %v279_v10 = vld [vmem:[#allocation5 + $0x18] sm:$0xff]  ;;  %s953_s26 = scalar_lea.hbm %s1005_s3, %s446_s11  ;;  %s301_s15 = scalar_lea.sflag [#allocation4], %s935_s19 }
  0x6f   : > { %v284_v7 = vld [vmem:[#allocation7] sm:$0xff]  ;;  %v280_v9 = vmul.f32 %v276_v5, %v256_v1  ;;  %v277_v11 = vld [vmem:[#allocation5 + $0x8] sm:$0xff]  ;;  %v287_v16 = vld [vmem:[#allocation7 + $0x18] sm:$0xff]  ;;  %v283_v18 = vmul.f32 %v279_v10, %v259_v2  ;;  %s621_s9 = scalar_lea.vmem %s948_s22, 512  ;;  %p1020_p2 = scmp.ne.s32.totalorder %s1016_s25, 0 }
  0x70   : > { %v285_v17 = vld [vmem:[#allocation7 + $0x8] sm:$0xff]  ;;  %v281_v19 = vmul.f32 %v277_v11, %v257_v3  ;;  %p622_p8 = scmp.ne.s32.totalorder %s948_s22, %s621_s9  ;;  %s715_s10 = smov [#allocation8]  }
  0x71   : > { %270 = vrot.lane.b32.xlu1 %v259_v2, %s714_s24  ;;  %266 = vrot.lane.b32.xlu0 %v257_v3, %s714_s24  ;;  %s625_s30 = sshll.u32 %s715_s10, 4  ;;  %s626_s30 = int_to_ptr.vmem [resolvable:$false] %s625_s30 }
  0x72   : > { %p623_p1 = pnand %p622_p8, %p1020_p2  ;;  %s627_s21 = scalar_lea.vmem %s626_s30, 1024 }
  0x73   : > { %p628_p3 = scmp.lt.s32.totalorder %s948_s22, %s626_s30  ;;  %p629_p5 = scmp.lt.s32.totalorder %s627_s21, %s621_s9 }
  0x74   : > { %p624_p10 = pneg %p623_p1 }
  0x75   : > { %p630_p9 = por %p629_p5, %p628_p3 }
  0x77   : > { %p631_p11 = pnand %p630_p9, %p624_p10 }
  0xdf   : > { %v269_v12 = vpop.permute.xlu1 %268  ;;  %v265_v13 = vpop.permute.xlu0 %264 }
  0xe0   : > { %v290_v14 = vmul.f32 %v286_v6, %v269_v12  ;;  %v288_v15 = vmul.f32 %v284_v7, %v265_v13 }
  0xe2   : > { %v294_v20 = vadd.f32 %v290_v14, %v282_v8  ;;  %v292_v21 = vadd.f32 %v288_v15, %v280_v9 }
  0xe3   : > { %v271_v22 = vpop.permute.xlu1 %270  ;;  %v267_v23 = vpop.permute.xlu0 %266 }
  0xe4   : > { %298 = vst [vmem:[%s251_s20 + $0x10] sm:$0xff] %v294_v20  ;;  %296 = vst [vmem:[%s251_s20] sm:$0xff] %v292_v21  ;;  %v291_v24 = vmul.f32 %v287_v16, %v271_v22  ;;  %v289_v25 = vmul.f32 %v285_v17, %v267_v23 }
  0xe6   : > { %v295_v26 = vadd.f32 %v291_v24, %v283_v18  ;;  %v293_v27 = vadd.f32 %v289_v25, %v281_v19 }
  0xe8   : > { %299 = vst [vmem:[%s251_s20 + $0x18] sm:$0xff] %v295_v26  ;;  %297 = vst [vmem:[%s251_s20 + $0x8] sm:$0xff] %v293_v27 }
  0xe9   : > { %634 = shalt.err (!%p631_p11)
}
  0xea   : > { %s635_s28 = scalar_lea.hbm %s953_s26, 512  ;;  %s639_s6 = scalar_lea.hbm %s1005_s3, 1024 }
  0xeb   : > { %p636_p0 = scmp.ne.s32.totalorder %s953_s26, %s635_s28  ;;  %p640_p6 = scmp.lt.u32.totalorder %s953_s26, %s1005_s3 }
  0xec   : > { %p641_p7 = scmp.lt.u32.totalorder %s639_s6, %s635_s28  ;;  %p643_p8 = scmp.lt.u32.totalorder %s635_s28, %s953_s26 }
  0xed   : > { %p637_p4 = pnand %p636_p0, %p1020_p2 }
  0xee   : > { %p642_p12 = por %p641_p7, %p640_p6 }
  0xef   : > { %p638_p13 = pneg %p637_p4 }
  0xf0   : > { %p644_p1 = por %p643_p8, %p642_p12 }
  0xf2   : > { %p645_p10 = pnand %p644_p1, %p638_p13 }
  0xf4   : > { %648 = shalt.err (!%p645_p10)
}
  0xf5   : > { %s716_s20 = smov 128   ;;  %s717_s11 = smov 8  }
  0xf6   : > { %457 = dma.vmem_to_hbm [thread:$0]  (%p1020_p2), %s948_s22, 512, %s953_s26, %s301_s15, %s716_s20, %s716_s20, %s717_s11  }
  0xf7 PF: > { %s331_s18 = sand.u32 1, %s687_s12   ;;  %p1021_p3 = scmp.ne.s32.totalorder %s1013_s23, 0 }
  0xf8   : > { %p1022_p5 = scmp.ge.s32.totalorder %s707_s17, 2  ;;  %s332_s8 = scalar_lea.sflag [#allocation4], %s331_s18 }
  0xfa   : > { %p471_p9 = pnand %p1022_p5, %p1021_p3 }
  0xfc   : > { %682 = dma.done.wait (!%p471_p9), %s332_s8, 512  }
  0xfd   : > { %684 = vsyncadd (!%p471_p9), %s332_s8, 4294966784  ;;  %s20_s17 = sadd.s32 1, %s707_s17   ;;  %s1023_s12 = smov %s691_s13 }
  0xfe   : > { %p17_p11 = scmp.ge.s32.totalorder %s20_s17, 4   ;;  %s1024_s13 = smov %s695_s14 }
  0xff   : > { %s1025_s14 = smov %s886_s5  ;;  %s1026_s15 = smov %s703_s16 }
 0x100   : > { %s1027_s16 = smov %s1029_s27  ;;  %19 = sbr.rel (!%p17_p11) target bundleno = 7 (0x7), region = 87 }
 0x107   :  { %337 = vsyncpa [#allocation3], 1 }
 0x108   :  { %339 = vsyncpa [#allocation3 + $0x1], 1 }
 0x109   :  { %340 = vsyncpa [#allocation6], 1 }
 0x10a   :  { %341 = vsyncpa [#allocation4], 1 }
 0x10b   :  { %343 = vsyncpa [#allocation4 + $0x1], 1 }

</bundles_post_ra>
